<compile_context>
chip_gen: v7x
topology: tpu7x:2x2x1
jax: 0.10.0
libtpu: 0.0.40
codegen_flags: <defaults>
</compile_context>

<pallas_src>
import jax
import jax.numpy as jnp
from jax import lax
from jax.experimental import pallas as pl
from jax.experimental.pallas import tpu as pltpu


# x(m, k) . w(n, k) contracted on both last dims -> (m, n); no transpose copy.
_CONTRACT_LAST = (((1,), (1,)), ((), ()))


def _linear_kernel_single_k(x_ref, w_ref, o_ref):
    """K fits in one block: single MXU matmul, write the tile directly."""
    o_ref[...] = lax.dot_general(
        x_ref[...], w_ref[...],
        dimension_numbers=_CONTRACT_LAST,
        preferred_element_type=jnp.float32,
    ).astype(o_ref.dtype)


def _linear_kernel_acc(x_ref, w_ref, o_ref, acc_ref):
    """General case: accumulate over the K grid axis in an f32 VMEM scratch."""
    @pl.when(pl.program_id(2) == 0)
    def _():
        acc_ref[...] = jnp.zeros_like(acc_ref)

    acc_ref[...] += lax.dot_general(
        x_ref[...], w_ref[...],
        dimension_numbers=_CONTRACT_LAST,
        preferred_element_type=jnp.float32,
    )

    @pl.when(pl.program_id(2) == pl.num_programs(2) - 1)
    def _():
        o_ref[...] = acc_ref[...].astype(o_ref.dtype)


def _round_up(x, m):
    return ((x + m - 1) // m) * m


# Tile caps (f32). Worst case tm=tn=512, tk=2048 -> double-buffered blocks
# 2*(4 + 4 + 1) MiB = 18 MiB, which fits comfortably under the explicit VMEM
# limit set below on every generation (v5e/v6e/v7x).
_TM_MAX = 512          # output rows per block (must be mult of 8 unless == M)
_TN_MAX = 512          # output cols per block (must be mult of 128 unless == N)
_TK_SINGLE_MAX = 2048  # up to this, keep the whole K reduction in one block
_TK_TILED = 512        # K tile when the reduction must be split


def linear_head_forward(rep, weight):
    """y = rep @ weight.T  (bias-free nn.Linear forward).

    rep:    (..., input_dim)
    weight: (output_dim, input_dim)  -- PyTorch layout, never transposed.
    """
    in_dim = rep.shape[-1]
    out_dim = weight.shape[0]
    assert weight.shape[1] == in_dim, "weight must be (output_dim, input_dim)"

    lead_shape = rep.shape[:-1]
    x = rep.reshape(-1, in_dim)            # (M, K)
    M, K = x.shape
    N = out_dim
    out_dtype = rep.dtype
    itemsize = jnp.dtype(out_dtype).itemsize

    # ---- tile selection -------------------------------------------------
    # Block dims must be divisible by (8, 128) or equal the full array dim;
    # ragged dims that need tiling are zero-padded (sliced off afterwards).
    if M <= _TM_MAX:
        tm, Mp = M, M
    else:
        tm = _TM_MAX
        Mp = _round_up(M, tm)

    if N <= _TN_MAX:
        tn, Np = N, N
    else:
        tn = _TN_MAX
        Np = _round_up(N, tn)

    single_k = K <= _TK_SINGLE_MAX
    if single_k:
        tk, Kp = K, K
    else:
        tk = _TK_TILED
        Kp = _round_up(K, tk)

    if (Mp, Kp) != (M, K):
        x = jnp.pad(x, ((0, Mp - M), (0, Kp - K)))
    w = weight
    if (Np, Kp) != (N, K):
        w = jnp.pad(w, ((0, Np - N), (0, Kp - K)))

    grid_m, grid_n = Mp // tm, Np // tn

    # ---- scheduling hints ------------------------------------------------
    cost = pl.CostEstimate(
        flops=2 * Mp * Np * Kp,
        transcendentals=0,
        bytes_accessed=(Mp * Kp + Np * Kp + Mp * Np) * itemsize,
    )

    # Double-buffered in/out blocks (+ f32 accumulator) with 2x headroom,
    # clamped to [32 MiB, 60 MiB]: above v5e's 16 MiB scoped default, below
    # v7x's 64 MiB physical VMEM.
    block_bytes = 2 * (tm * tk + tk * tn + tm * tn) * itemsize + tm * tn * 4
    vmem_limit = int(min(max(2 * block_bytes, 32 * 1024 * 1024),
                         60 * 1024 * 1024))

    # ---- pallas_call ------------------------------------------------------
    if single_k:
        grid = (grid_m, grid_n)
        kernel = _linear_kernel_single_k
        in_specs = [
            pl.BlockSpec((tm, tk), lambda i, j: (i, 0)),   # x  (M, K)
            pl.BlockSpec((tn, tk), lambda i, j: (j, 0)),   # W  (N, K)
        ]
        out_specs = pl.BlockSpec((tm, tn), lambda i, j: (i, j))
        scratch_shapes = []
        dim_sem = ("parallel", "parallel")
    else:
        grid = (grid_m, grid_n, Kp // tk)                  # reduction axis last
        kernel = _linear_kernel_acc
        in_specs = [
            pl.BlockSpec((tm, tk), lambda i, j, k: (i, k)),
            pl.BlockSpec((tn, tk), lambda i, j, k: (j, k)),
        ]
        out_specs = pl.BlockSpec((tm, tn), lambda i, j, k: (i, j))
        scratch_shapes = [pltpu.VMEM((tm, tn), jnp.float32)]
        dim_sem = ("parallel", "parallel", "arbitrary")

    out = pl.pallas_call(
        kernel,
        out_shape=jax.ShapeDtypeStruct((Mp, Np), out_dtype),
        grid_spec=pltpu.PrefetchScalarGridSpec(
            num_scalar_prefetch=0,
            grid=grid,
            in_specs=in_specs,
            out_specs=out_specs,
            scratch_shapes=scratch_shapes,
        ),
        compiler_params=pltpu.CompilerParams(
            dimension_semantics=dim_sem,
            vmem_limit_bytes=vmem_limit,
        ),
        cost_estimate=cost,
    )(x, w)

    if (Mp, Np) != (M, N):
        out = out[:M, :N]
    return out.reshape(*lead_shape, N)


class LinearHead:
    """JAX/Pallas port of the PyTorch LinearHead (bias-free linear)."""

    def __init__(self, input_dim: int = 768, output_dim: int = 768, *, key=None):
        if key is None:
            key = jax.random.PRNGKey(0)
        bound = 1.0 / (input_dim ** 0.5)
        # PyTorch layout (output_dim, input_dim); kept as-is, no transpose at call time.
        self.weight = jax.random.uniform(
            key, (output_dim, input_dim), dtype=jnp.float32,
            minval=-bound, maxval=bound,
        )
        self.config = {"input_dim": input_dim, "output_dim": output_dim}
        # TODO(synk): load()/save() checkpoint I/O from the torch module is not ported.

    def __call__(self, rep):
        return linear_head_forward(rep, self.weight)


if __name__ == "__main__":
    key = jax.random.PRNGKey(0)
    k_w, k_x1, k_x2 = jax.random.split(key, 3)

    batch, input_dim, output_dim = 8, 32, 32
    head = LinearHead(input_dim=input_dim, output_dim=output_dim, key=k_w)

    # 2-D rep
    rep = jax.random.normal(k_x1, (batch, input_dim), dtype=jnp.float32)
    out = jax.block_until_ready(head(rep))
    ref = rep @ head.weight.T
    assert out.shape == (batch, output_dim)
    assert jnp.allclose(out, ref, atol=1e-5, rtol=1e-5), "mismatch vs reference (2-D)"

    # Leading-dims rep (e.g. (batch, seq, hidden)) — same semantics as nn.Linear
    rep3 = jax.random.normal(k_x2, (2, 4, input_dim), dtype=jnp.float32)
    out3 = jax.block_until_ready(head(rep3))
    ref3 = rep3 @ head.weight.T
    assert out3.shape == (2, 4, output_dim)
    assert jnp.allclose(out3, ref3, atol=1e-5, rtol=1e-5), "mismatch vs reference (3-D)"

    print("KERNEL_OK")
</pallas_src>

<mosaic_0001>
module attributes {stable_mosaic.version = 11 : i64} {
  func.func @_linear_kernel_single_k(%arg0: i32, %arg1: i32, %arg2: memref<8x32xf32, #tpu.memory_space<vmem>>, %arg3: memref<32x32xf32, #tpu.memory_space<vmem>>, %arg4: memref<8x32xf32, #tpu.memory_space<vmem>>) attributes {dimension_semantics = [#tpu.dimension_semantics<parallel>, #tpu.dimension_semantics<parallel>], iteration_bounds = array<i64: 1, 1>, scalar_prefetch = 0 : i64, scratch_operands = 0 : i64, tpu.core_type = #tpu.core_type<tc>, window_params = [{transform_indices = @transform_0, window_bounds = array<i64: 8, 32>}, {transform_indices = @transform_1, window_bounds = array<i64: 32, 32>}, {transform_indices = @transform_2, window_bounds = array<i64: 8, 32>}]} {
    %c0 = arith.constant 0 : index
    %c0_0 = arith.constant 0 : index
    %0 = vector.load %arg2[%c0, %c0_0] : memref<8x32xf32, #tpu.memory_space<vmem>>, vector<8x32xf32>
    %c0_1 = arith.constant 0 : index
    %c0_2 = arith.constant 0 : index
    %1 = vector.load %arg3[%c0_1, %c0_2] : memref<32x32xf32, #tpu.memory_space<vmem>>, vector<32x32xf32>
    %cst = arith.constant dense<0.000000e+00> : vector<8x32xf32>
    %2 = tpu.matmul %0, %1, %cst {dimension_numbers = #tpu.dot_dimension_numbers<[1], [1], [0], [0], [0, 0, 1, 0], [], []>} : vector<8x32xf32>, vector<32x32xf32>, vector<8x32xf32> -> vector<8x32xf32>
    %c0_3 = arith.constant 0 : index
    %c0_4 = arith.constant 0 : index
    %3 = vector.load %arg4[%c0_3, %c0_4] : memref<8x32xf32, #tpu.memory_space<vmem>>, vector<8x32xf32>
    tpu.vector_store %arg4[%c0_3, %c0_4], %2 {strides = array<i32>} : memref<8x32xf32, #tpu.memory_space<vmem>>, vector<8x32xf32>,
    return
  }
  func.func @transform_0(%arg0: i32, %arg1: i32) -> (i32, i32) {
    %c0_i32 = arith.constant 0 : i32
    %c0_i32_0 = arith.constant 0 : i32
    return %arg0, %c0_i32 : i32, i32
  }
  func.func @transform_1(%arg0: i32, %arg1: i32) -> (i32, i32) {
    %c0_i32 = arith.constant 0 : i32
    %c0_i32_0 = arith.constant 0 : i32
    return %arg1, %c0_i32 : i32, i32
  }
  func.func @transform_2(%arg0: i32, %arg1: i32) -> (i32, i32) {
    %c0_i32 = arith.constant 0 : i32
    return %arg0, %arg1 : i32, i32
  }
}

</mosaic_0001>

<bundles_post_ra>
// kernel: tpu_custom_call.1
= control target key start
LH: loop header
LB: loop body
LE: loop exit
PB: predicated region body
PF: predicated region fallthrough
CT: control target
= control target key end

     0   :  { %7 = vsyncpa [#allocation3], 0  ;;  %s325_s0 = inlined_call_operand.hbm [shape: f32[8,32], index: 0, kind: input, shape index: {}]   ;;  %s326_s1 = inlined_call_operand.hbm [shape: f32[32,32], index: 1, kind: input, shape index: {}]   ;;  %s327_s2 = inlined_call_operand.hbm [shape: f32[8,32], index: 2, kind: output, shape index: {}]  }
   0x1   :  { %8 = vsyncpa [#allocation6], 0 }
   0x2   :  { %9 = vsyncpa [#allocation4], 0  ;;  %s255_s9 = smov [#allocation2]   ;;  %s256_s11 = smov [#allocation5]  }
   0x3   :  { %s16_s10 = sshll.u32 %s255_s9, 4  ;;  %s25_s12 = sshll.u32 %s256_s11, 4  ;;  %s17_s10 = int_to_ptr.vmem [resolvable:$true] %s16_s10  ;;  %s278_s12 = int_to_ptr.vmem [resolvable:$true] %s25_s12 }
   0x4   :  { %s183_s15 = scalar_lea.hbm %s325_s0, 128 }
   0x5   :  { %p184_p0 = scmp.ne.s32.totalorder %s325_s0, %s183_s15  ;;  %p187_p1 = scmp.lt.u32.totalorder %s183_s15, %s325_s0 }
   0x7   :  { %p189_p2 = pnand %p187_p1, %p184_p0 }
   0x9   :  { %192 = shalt.err (!%p189_p2)
}
   0xa   :  { %s193_s20 = scalar_lea.vmem %s17_s10, 128  ;;  %p198_p4 = scmp.lt.s32.totalorder %s17_s10, %s17_s10 }
   0xb   :  { %p194_p3 = scmp.ne.s32.totalorder %s17_s10, %s193_s20  ;;  %p199_p5 = scmp.lt.s32.totalorder %s193_s20, %s193_s20 }
   0xd   :  { %p200_p6 = por %p199_p5, %p198_p4 }
   0xf   :  { %p201_p7 = pnand %p200_p6, %p194_p3 }
  0x11   :  { %204 = shalt.err (!%p201_p7)
}
  0x12   :  { %19 = dma.hbm_to_vmem [thread:$0]  %s325_s0, 128, %s17_s10, [#allocation3]  }
  0x13   :  { %s205_s25 = scalar_lea.hbm %s326_s1, 512 }
  0x14   :  { %p206_p8 = scmp.ne.s32.totalorder %s326_s1, %s205_s25  ;;  %p209_p9 = scmp.lt.u32.totalorder %s205_s25, %s326_s1 }
  0x16   :  { %p211_p10 = pnand %p209_p9, %p206_p8 }
  0x18   :  { %214 = shalt.err (!%p211_p10)
}
  0x19   :  { %s215_s30 = scalar_lea.vmem %s278_s12, 512  ;;  %p220_p12 = scmp.lt.s32.totalorder %s278_s12, %s278_s12 }
  0x1a   :  { %p216_p11 = scmp.ne.s32.totalorder %s278_s12, %s215_s30  ;;  %p221_p13 = scmp.lt.s32.totalorder %s215_s30, %s215_s30 }
  0x1c   :  { %p222_p0 = por %p221_p13, %p220_p12 }
  0x1e   :  { %p223_p1 = pnand %p222_p0, %p216_p11 }
  0x20   :  { %226 = shalt.err (!%p223_p1)
}
  0x21   :  { %s257_s0 = smov 128   ;;  %s258_s3 = smov 8  }
  0x22   :  { %31 = dma.hbm_to_vmem [thread:$0]  %s326_s1, 512, %s278_s12, [#allocation6], %s257_s0, %s257_s0, %s258_s3  }
  0x23   :  { %249 = dma.done.wait [#allocation3], 128  }
  0x24   :  { %250 = vsyncadd [#allocation3], 4294967168 }
  0x25   :  { %251 = dma.done.wait [#allocation6], 512  }
  0x26   :  { %252 = vsyncadd [#allocation6], 4294966784  ;;  %v259_v0 = vmov 0.0|0.0   ;;  %vm260_vm0 = vmmov 0   ;;  %v261_v1 = vmov 0.0   ;;  %vm43_vm1 = vcmask 261120  }
  0x27   :  { %167 = vmatprep.subr.bf16.mxu0 %v259_v0  ;;  %164 = vmatprep.mubr.msk.f32.mxu0 %vm260_vm0, %v261_v1  ;;  %v39_v2 = vld [vmem:[#allocation5] sm:$0xff]  ;;  %v40_v3 = vld [vmem:[#allocation5 + $0x8] sm:$0xff]  ;;  %vm169_vm2 = vmpackc.low %vm43_vm1, %vm43_vm1  ;;  %s262_s1 = smov [#allocation7]  }
  0x28   :  { %v168_v4 = vpack.c.bf16 %v40_v3, %v39_v2  ;;  %v41_v5 = vld [vmem:[#allocation5 + $0x10] sm:$0xff]  ;;  %v42_v6 = vld [vmem:[#allocation5 + $0x18] sm:$0xff]  ;;  %s136_s6 = sshll.u32 %s262_s1, 4  ;;  %s137_s6 = int_to_ptr.vmem [resolvable:$true] %s136_s6 }
  0x29   :  { %v172_v7 = vpack.c.bf16 %v42_v6, %v41_v5  ;;  %v38_v8 = vld [vmem:[#allocation2] sm:$0xff]  ;;  %s227_s7 = scalar_lea.vmem %s137_s6, 128  ;;  %p232_p3 = scmp.lt.s32.totalorder %s137_s6, %s137_s6 }
  0x2a   :  { %170 = vmatpush3.bf16.xpose.msk.msra.mxu0 %vm169_vm2, %v168_v4  ;;  %p228_p2 = scmp.ne.s32.totalorder %s137_s6, %s227_s7  ;;  %p233_p4 = scmp.lt.s32.totalorder %s227_s7, %s227_s7 }
  0x2b   :  { %171 = vmatprep.subr.bf16.mxu0 %v259_v0 }
  0x2c   :  { %p234_p5 = por %p233_p4, %p232_p3 }
  0x2e   :  { %p235_p6 = pnand %p234_p5, %p228_p2 }
  0x32   :  { %174 = vmatpush3.bf16.xpose.msk.msra.mxu0 %vm169_vm2, %v172_v7 }
  0x39   :  { %165 = vmatmul.mubr.msk.f32.vlgmr.msra.gmra.mrb[0].mxu0 %vm43_vm1, %v38_v8 }
 0x10c   :  { %v125_v9 = vpop.f32.mrb[0].mxu0 }
 0x10d   :  { %129 = vst.msk [vmem:[#allocation7] sm:$0xff] %vm43_vm1, %v125_v9  ;;  %v166_v10 = vpop.f32.mrb[1].mxu0 }
 0x10e   :  { %238 = shalt.err (!%p235_p6)
}
 0x10f   :  { %s239_s10 = scalar_lea.hbm %s327_s2, 128 }
 0x110   :  { %p240_p7 = scmp.ne.s32.totalorder %s327_s2, %s239_s10  ;;  %p243_p8 = scmp.lt.u32.totalorder %s239_s10, %s327_s2 }
 0x112   :  { %p245_p9 = pnand %p243_p8, %p240_p7 }
 0x114   :  { %248 = shalt.err (!%p245_p9)
}
 0x115   :  { %139 = dma.vmem_to_hbm [thread:$0]  %s137_s6, 128, %s327_s2, [#allocation4]  }
 0x116   :  { %253 = dma.done.wait [#allocation4], 128  }
 0x117   :  { %254 = vsyncadd [#allocation4], 4294967168 }
 0x118   :  { %143 = vsyncpa [#allocation3], 1 }
 0x119   :  { %144 = vsyncpa [#allocation6], 1 }
 0x11a   :  { %145 = vsyncpa [#allocation4], 1 }

</bundles_post_ra>
